<compile_context>
chip_gen: v7x
topology: tpu7x:2x2x1
jax: 0.10.0
libtpu: 0.0.40
codegen_flags: <defaults>
</compile_context>

<pallas_src>
import functools

import jax
import jax.numpy as jnp
from jax.experimental import pallas as pl
from jax.experimental.pallas import tpu as pltpu


def _smooth_sigmoid_kernel(scale_ref, x_ref, o_ref, *, half_k):
    # scale lives in SMEM as a single f32 scalar.
    half_scale = 0.5 * scale_ref[0]
    # Upcast in-register (no extra HBM pass); EUP tanh; store in HBM dtype.
    x = x_ref[...].astype(jnp.float32)
    y = half_scale + half_scale * jnp.tanh(half_k * x)
    o_ref[...] = y.astype(o_ref.dtype)


def smooth_sigmoid(x, scale, *, k=1.0, lanes=512, max_block_rows=1024):
    """scale * sigmoid(k * x), elementwise, via a Pallas TPU kernel.

    x     : any-shape float array (NCHW in the reference module).
    scale : scalar parameter (shape () or (1,)).
    """
    orig_shape = x.shape
    orig_dtype = x.dtype
    n = x.size

    # Flatten to a lane-dense 2-D slab; pad only the (< lanes) tail needed for
    # the reshape.  Row remainders are handled by Pallas partial blocks.
    x_flat = jnp.ravel(x)
    pad = (-n) % lanes
    if pad:
        x_flat = jnp.pad(x_flat, (0, pad))
    rows = x_flat.size // lanes
    x2d = x_flat.reshape(rows, lanes)

    # Biggest block that fits the per-generation VMEM budget comfortably:
    # (1024, 512) f32 = 2 MiB/buffer -> ~8 MiB with double-buffered in+out.
    block_rows = min(rows, max_block_rows)
    if block_rows != rows:
        # Not the full extent -> must be a multiple of 8 (sublane tiling).
        block_rows = max(8, (block_rows // 8) * 8)

    grid = (pl.cdiv(rows, block_rows),)

    scale_arr = jnp.asarray(scale, jnp.float32).reshape((1,))
    kernel = functools.partial(_smooth_sigmoid_kernel, half_k=0.5 * float(k))

    out2d = pl.pallas_call(
        kernel,
        out_shape=jax.ShapeDtypeStruct((rows, lanes), orig_dtype),
        grid=grid,
        in_specs=[
            pl.BlockSpec(memory_space=pltpu.SMEM),                # scale scalar
            pl.BlockSpec((block_rows, lanes), lambda i: (i, 0)),  # x tile
        ],
        out_specs=pl.BlockSpec((block_rows, lanes), lambda i: (i, 0)),
        compiler_params=pltpu.CompilerParams(
            dimension_semantics=("parallel",),
        ),
    )(scale_arr, x2d)

    out_flat = out2d.reshape(-1)
    if pad:
        out_flat = out_flat[:n]
    return out_flat.reshape(orig_shape)


if __name__ == "__main__":
    key = jax.random.PRNGKey(0)

    # Small NCHW input consistent with how the module would be used.
    x = jax.random.normal(key, (2, 4, 16, 16), dtype=jnp.float32)

    # Deterministic parameter init, matching nn.Parameter(torch.tensor(1.0)).
    scale = jnp.float32(1.0)
    slope_k = 1.0

    out = smooth_sigmoid(x, scale, k=slope_k)
    out = jax.block_until_ready(out)

    # Reference check against plain JAX.
    ref = scale * (1.0 / (1.0 + jnp.exp(-slope_k * x)))
    assert out.shape == x.shape and out.dtype == x.dtype
    assert jnp.max(jnp.abs(out - ref)) < 1e-5

    print("KERNEL_OK")
</pallas_src>

<mosaic_0001>
module attributes {stable_mosaic.version = 11 : i64} {
  func.func @_smooth_sigmoid_kernel(%arg0: i32, %arg1: memref<1xf32, #tpu.memory_space<smem>>, %arg2: memref<4x512xf32, #tpu.memory_space<vmem>>, %arg3: memref<4x512xf32, #tpu.memory_space<vmem>>) attributes {dimension_semantics = [#tpu.dimension_semantics<parallel>], iteration_bounds = array<i64: 1>, scalar_prefetch = 0 : i64, scratch_operands = 0 : i64, tpu.core_type = #tpu.core_type<tc>, window_params = [{transform_indices = @transform_0, window_bounds = array<i64: 1>}, {transform_indices = @transform_1, window_bounds = array<i64: 4, 512>}, {transform_indices = @transform_2, window_bounds = array<i64: 4, 512>}]} {
    %c0 = arith.constant 0 : index
    %0 = memref.load %arg1[%c0] : memref<1xf32, #tpu.memory_space<smem>>
    %cst = arith.constant 5.000000e-01 : f32
    %1 = arith.mulf %cst, %0 : f32
    %c0_0 = arith.constant 0 : index
    %c0_1 = arith.constant 0 : index
    %2 = vector.load %arg2[%c0_0, %c0_1] : memref<4x512xf32, #tpu.memory_space<vmem>>, vector<4x512xf32>
    %cst_2 = arith.constant 5.000000e-01 : f32
    %3 = vector.broadcast %cst_2 : f32 to vector<4x512xf32>
    %4 = arith.mulf %3, %2 : vector<4x512xf32>
    %5 = math.tanh %4 : vector<4x512xf32>
    %6 = vector.broadcast %1 : f32 to vector<4x512xf32>
    %7 = arith.mulf %6, %5 : vector<4x512xf32>
    %8 = vector.broadcast %1 : f32 to vector<4x512xf32>
    %9 = arith.addf %8, %7 : vector<4x512xf32>
    %c0_3 = arith.constant 0 : index
    %c0_4 = arith.constant 0 : index
    %10 = vector.load %arg3[%c0_3, %c0_4] : memref<4x512xf32, #tpu.memory_space<vmem>>, vector<4x512xf32>
    tpu.vector_store %arg3[%c0_3, %c0_4], %9 {strides = array<i32>} : memref<4x512xf32, #tpu.memory_space<vmem>>, vector<4x512xf32>,
    return
  }
  func.func @transform_0(%arg0: i32) -> i32 {
    %c0_i32 = arith.constant 0 : i32
    %c0_i32_0 = arith.constant 0 : i32
    return %c0_i32 : i32
  }
  func.func @transform_1(%arg0: i32) -> (i32, i32) {
    %c0_i32 = arith.constant 0 : i32
    %c0_i32_0 = arith.constant 0 : i32
    return %arg0, %c0_i32 : i32, i32
  }
  func.func @transform_2(%arg0: i32) -> (i32, i32) {
    %c0_i32 = arith.constant 0 : i32
    %c0_i32_0 = arith.constant 0 : i32
    return %arg0, %c0_i32 : i32, i32
  }
}

</mosaic_0001>

<bundles_post_ra>
// kernel: tpu_custom_call.1
= control target key start
LH: loop header
LB: loop body
LE: loop exit
PB: predicated region body
PF: predicated region fallthrough
CT: control target
= control target key end

     0   :  { %8 = vsyncpa [#allocation4], 0  ;;  %s153_s0 = inlined_call_operand.<no memory space> [shape: f32[1], index: 0, kind: input, shape index: {}]   ;;  %s154_s1 = inlined_call_operand.hbm [shape: f32[4,512], index: 1, kind: input, shape index: {}]   ;;  %s155_s2 = inlined_call_operand.hbm [shape: f32[4,512], index: 2, kind: output, shape index: {}]  }
   0x1   :  { %9 = vsyncpa [#allocation5], 0  ;;  %s109_s9 = smov [#allocation3]   ;;  %s61_s13 = scalar_lea.hbm %s154_s1, 256 }
   0x2   :  { %s18_s10 = sshll.u32 %s109_s9, 4  ;;  %p62_p0 = scmp.ne.s32.totalorder %s154_s1, %s61_s13  ;;  %s19_s10 = int_to_ptr.vmem [resolvable:$true] %s18_s10 }
   0x3   :  { %p65_p1 = scmp.lt.u32.totalorder %s61_s13, %s154_s1 }
   0x5   :  { %p67_p2 = pnand %p65_p1, %p62_p0 }
   0x7   :  { %70 = shalt.err (!%p67_p2)
}
   0x8   :  { %s71_s18 = scalar_lea.vmem %s19_s10, 256  ;;  %p76_p4 = scmp.lt.s32.totalorder %s19_s10, %s19_s10 }
   0x9   :  { %p72_p3 = scmp.ne.s32.totalorder %s19_s10, %s71_s18  ;;  %p77_p5 = scmp.lt.s32.totalorder %s71_s18, %s71_s18 }
   0xb   :  { %p78_p6 = por %p77_p5, %p76_p4 }
   0xd   :  { %p79_p7 = pnand %p78_p6, %p72_p3 }
   0xf   :  { %82 = shalt.err (!%p79_p7)
}
  0x10   :  { %21 = dma.hbm_to_vmem [thread:$0]  %s154_s1, 256, %s19_s10, [#allocation4]  }
  0x11   :  { %105 = dma.done.wait [#allocation4], 256  }
  0x12   :  { %106 = vsyncadd [#allocation4], 4294967040  ;;  %v27_v0 = vld [vmem:[#allocation3] sm:$0xff]  ;;  %v28_v1 = vld [vmem:[#allocation3 + $0x8] sm:$0xff]  ;;  %s26_s23 = smul.f32 0.5, %s153_s0  ;;  %s110_s24 = smov [#allocation6]  }
  0x13   :  { %v29_v2 = vmul.f32 0.5, %v27_v0  ;;  %v30_v3 = vmul.f32 0.5, %v28_v1  ;;  %s46_s25 = sshll.u32 %s110_s24, 4  ;;  %s47_s25 = int_to_ptr.vmem [resolvable:$true] %s46_s25 }
  0x14   :  { %v33_v4 = vstv %s26_s23  ;;  %s83_s1 = scalar_lea.vmem %s47_s25, 256  ;;  %p88_p9 = scmp.lt.s32.totalorder %s47_s25, %s47_s25 }
  0x15   :  { %57 = vtanh.f32 %v29_v2  ;;  %p84_p8 = scmp.ne.s32.totalorder %s47_s25, %s83_s1  ;;  %p89_p10 = scmp.lt.s32.totalorder %s83_s1, %s83_s1 }
  0x16   :  { %59 = vtanh.f32 %v30_v3 }
  0x17   :  { %p90_p11 = por %p89_p10, %p88_p9 }
  0x19   :  { %p91_p12 = pnand %p90_p11, %p84_p8 }
  0x1f   :  { %v58_v5 = vpop.eup %57 }
  0x20   :  { %v60_v6 = vpop.eup %59  ;;  %v34_v7 = vmul.f32 %v58_v5, %v33_v4 }
  0x21   :  { %v35_v8 = vmul.f32 %v60_v6, %v33_v4 }
  0x22   :  { %v36_v9 = vadd.f32 %v34_v7, %v33_v4 }
  0x23   :  { %v37_v10 = vadd.f32 %v35_v8, %v33_v4 }
  0x24   :  { %38 = vst [vmem:[#allocation6] sm:$0xff] %v36_v9 }
  0x25   :  { %39 = vst [vmem:[#allocation6 + $0x8] sm:$0xff] %v37_v10 }
  0x26   :  { %94 = shalt.err (!%p91_p12)
}
  0x27   :  { %s95_s27 = scalar_lea.hbm %s155_s2, 256 }
  0x28   :  { %p96_p13 = scmp.ne.s32.totalorder %s155_s2, %s95_s27  ;;  %p99_p0 = scmp.lt.u32.totalorder %s95_s27, %s155_s2 }
  0x2a   :  { %p101_p1 = pnand %p99_p0, %p96_p13 }
  0x2c   :  { %104 = shalt.err (!%p101_p1)
}
  0x2d   :  { %49 = dma.vmem_to_hbm [thread:$0]  %s47_s25, 256, %s155_s2, [#allocation5]  }
  0x2e   :  { %107 = dma.done.wait [#allocation5], 256  }
  0x2f   :  { %108 = vsyncadd [#allocation5], 4294967040 }
  0x30   :  { %53 = vsyncpa [#allocation4], 1 }
  0x31   :  { %54 = vsyncpa [#allocation5], 1 }

</bundles_post_ra>
